<compile_context>
chip_gen: v7x
topology: tpu7x:2x2x1
jax: 0.10.0
libtpu: 0.0.40
codegen_flags: <defaults>
</compile_context>

<pallas_src>
import functools

import jax
import jax.numpy as jnp
from jax.experimental import pallas as pl
from jax.experimental.pallas import tpu as pltpu

_LN_EPS = 1e-5  # PyTorch nn.LayerNorm default


def _round_up(x: int, m: int) -> int:
    return (x + m - 1) // m * m


def mlp_block_kernel(x_ref, w_ref, b_ref, g_ref, beta_ref, o_ref, acc_ref,
                     *, d_out_real: int):
    """Grid = (M tiles, K tiles). Accumulate over K, epilogue at the last K step."""
    k = pl.program_id(1)

    @pl.when(k == 0)
    def _():
        acc_ref[...] = jnp.zeros_like(acc_ref)

    # MXU matmul in the (possibly bf16) operand dtype, f32 accumulation.
    acc_ref[...] += jnp.dot(x_ref[...], w_ref[...],
                            preferred_element_type=jnp.float32)

    @pl.when(k == pl.num_programs(1) - 1)
    def _():
        y = acc_ref[...] + b_ref[...]                      # f32 [tm, Dout_pad]
        # LayerNorm over the real feature width. Padded columns are exactly zero
        # (zero-padded W and b), so sum / sum-of-squares over the padded row equal
        # the sums over the real columns; divide by the *real* Dout.
        inv_d = jnp.float32(1.0 / d_out_real)
        s = jnp.sum(y, axis=-1, keepdims=True)
        ss = jnp.sum(y * y, axis=-1, keepdims=True)
        mean = s * inv_d
        var = jnp.maximum(ss * inv_d - mean * mean, 0.0)   # biased variance
        yn = (y - mean) * jax.lax.rsqrt(var + _LN_EPS)
        yn = yn * g_ref[...] + beta_ref[...]               # padded gamma/beta are 0
        o_ref[...] = jnp.maximum(yn, 0.0).astype(o_ref.dtype)


def mlp_block_forward(x, w, b, gamma, beta, *, tm=256, tk=512,
                      mxu_dtype=jnp.float32):
    """x: [B, Din]; w: [Din, Dout] (pre-transposed nn.Linear weight);
    b, gamma, beta: [Dout]. Returns ReLU(LayerNorm(x @ w + b)) in x.dtype."""
    B, Din = x.shape
    Din_w, Dout = w.shape
    assert Din_w == Din
    out_dtype = x.dtype

    # ---- tile / pad sizing -------------------------------------------------
    Dout_pad = _round_up(Dout, 128)           # lane-dense output stores
    if Din <= tk:                             # small K: single step, full extent
        tk_eff, Din_pad = Din, Din
    else:
        tk_eff = tk
        Din_pad = _round_up(Din, tk_eff)
    tm_eff = min(tm, _round_up(B, 8))         # clamp for tiny batches
    B_pad = _round_up(B, tm_eff)

    # ---- zero-pad operands (keeps LayerNorm exact; see kernel comment) ------
    x_p = jnp.zeros((B_pad, Din_pad), mxu_dtype).at[:B, :Din].set(
        x.astype(mxu_dtype))
    w_p = jnp.zeros((Din_pad, Dout_pad), mxu_dtype).at[:Din, :Dout].set(
        w.astype(mxu_dtype))
    b_p = jnp.zeros((1, Dout_pad), jnp.float32).at[0, :Dout].set(
        b.astype(jnp.float32))
    g_p = jnp.zeros((1, Dout_pad), jnp.float32).at[0, :Dout].set(
        gamma.astype(jnp.float32))
    be_p = jnp.zeros((1, Dout_pad), jnp.float32).at[0, :Dout].set(
        beta.astype(jnp.float32))

    n_m = B_pad // tm_eff
    n_k = Din_pad // tk_eff
    it_mxu = jnp.dtype(mxu_dtype).itemsize
    it_out = jnp.dtype(out_dtype).itemsize

    # ---- VMEM budget / compiler params --------------------------------------
    vmem_needed = (2 * tm_eff * tk_eff * it_mxu          # x tile (double-buffered)
                   + 2 * tk_eff * Dout_pad * it_mxu      # weight tile
                   + 2 * tm_eff * Dout_pad * it_out      # output tile
                   + tm_eff * Dout_pad * 4               # f32 accumulator
                   + 3 * 2 * Dout_pad * 4)               # bias / gamma / beta
    vmem_limit = int(min(max(int(vmem_needed * 1.5), 32 * 1024 * 1024),
                         64 * 1024 * 1024))              # stay inside v7x's 64 MiB

    cost = pl.CostEstimate(
        flops=2 * B_pad * Din_pad * Dout_pad,
        transcendentals=0,
        bytes_accessed=(B_pad * Din_pad * it_mxu
                        + n_m * Din_pad * Dout_pad * it_mxu
                        + B_pad * Dout_pad * it_out))

    kernel = functools.partial(mlp_block_kernel, d_out_real=Dout)

    out_p = pl.pallas_call(
        kernel,
        out_shape=jax.ShapeDtypeStruct((B_pad, Dout_pad), out_dtype),
        grid_spec=pltpu.PrefetchScalarGridSpec(
            num_scalar_prefetch=0,
            grid=(n_m, n_k),
            in_specs=[
                pl.BlockSpec((tm_eff, tk_eff), lambda i, k: (i, k)),   # x tile
                pl.BlockSpec((tk_eff, Dout_pad), lambda i, k: (k, 0)),  # W K-slab
                pl.BlockSpec((1, Dout_pad), lambda i, k: (0, 0)),       # bias
                pl.BlockSpec((1, Dout_pad), lambda i, k: (0, 0)),       # gamma
                pl.BlockSpec((1, Dout_pad), lambda i, k: (0, 0)),       # beta
            ],
            out_specs=pl.BlockSpec((tm_eff, Dout_pad), lambda i, k: (i, 0)),
            scratch_shapes=[pltpu.VMEM((tm_eff, Dout_pad), jnp.float32)],
        ),
        compiler_params=pltpu.CompilerParams(
            dimension_semantics=("parallel", "arbitrary"),
            vmem_limit_bytes=vmem_limit),
        cost_estimate=cost,
    )(x_p, w_p, b_p, g_p, be_p)

    return out_p[:B, :Dout]


def mlp_block_reference(x, w, b, gamma, beta):
    y = x @ w + b
    mean = jnp.mean(y, axis=-1, keepdims=True)
    var = jnp.mean(jnp.square(y - mean), axis=-1, keepdims=True)
    yn = (y - mean) / jnp.sqrt(var + _LN_EPS)
    yn = yn * gamma + beta
    return jnp.maximum(yn, 0.0)


def _make_inputs(key, B, Din, Dout):
    kx, kw, kb = jax.random.split(key, 3)
    x = jax.random.normal(kx, (B, Din), dtype=jnp.float32)
    bound = 1.0 / (Din ** 0.5)                      # nn.Linear default init range
    w = jax.random.uniform(kw, (Din, Dout), jnp.float32, -bound, bound)
    b = jax.random.uniform(kb, (Dout,), jnp.float32, -bound, bound)
    gamma = jnp.ones((Dout,), jnp.float32)          # nn.LayerNorm default affine
    beta = jnp.zeros((Dout,), jnp.float32)
    return x, w, b, gamma, beta


if __name__ == "__main__":
    key = jax.random.PRNGKey(0)
    k1, k2 = jax.random.split(key)

    # Small shapes consistent with the module's forward: x [batch, in_dim].
    x, w, b, gamma, beta = _make_inputs(k1, B=8, Din=32, Dout=32)
    out = jax.block_until_ready(mlp_block_forward(x, w, b, gamma, beta))
    ref = mlp_block_reference(x, w, b, gamma, beta)
    assert jnp.allclose(out, ref, atol=1e-4, rtol=1e-4), "f32 mismatch vs reference"

    # Moderate shape exercising batch/K/Dout padding, K-streaming accumulation,
    # and the bf16 MXU-operand path (f32 accumulation + f32 LayerNorm epilogue).
    x2, w2, b2, g2, be2 = _make_inputs(k2, B=72, Din=640, Dout=192)
    out2 = jax.block_until_ready(
        mlp_block_forward(x2, w2, b2, g2, be2, tm=128, tk=512))
    ref2 = mlp_block_reference(x2, w2, b2, g2, be2)
    assert jnp.allclose(out2, ref2, atol=1e-3, rtol=1e-3), "f32 padded mismatch"

    out2_bf16 = jax.block_until_ready(
        mlp_block_forward(x2, w2, b2, g2, be2, tm=128, tk=512,
                          mxu_dtype=jnp.bfloat16))
    assert jnp.allclose(out2_bf16, ref2, atol=1e-1, rtol=1e-1), "bf16 mismatch"

    # TODO(synk): record_activations=True returns a dict of detached/cpu intermediate
    # stage tensors — host-side bookkeeping, not expressed in the kernel.
    print("KERNEL_OK")
</pallas_src>

<mosaic_0001>
module attributes {stable_mosaic.version = 11 : i64} {
  func.func @mlp_block_kernel(%arg0: i32, %arg1: i32, %arg2: memref<8x32xf32, #tpu.memory_space<vmem>>, %arg3: memref<32x128xf32, #tpu.memory_space<vmem>>, %arg4: memref<1x128xf32, #tpu.memory_space<vmem>>, %arg5: memref<1x128xf32, #tpu.memory_space<vmem>>, %arg6: memref<1x128xf32, #tpu.memory_space<vmem>>, %arg7: memref<8x128xf32, #tpu.memory_space<vmem>>, %arg8: memref<8x128xf32, #tpu.memory_space<vmem>>) attributes {dimension_semantics = [#tpu.dimension_semantics<parallel>, #tpu.dimension_semantics<arbitrary>], iteration_bounds = array<i64: 1, 1>, scalar_prefetch = 0 : i64, scratch_operands = 1 : i64, tpu.core_type = #tpu.core_type<tc>, window_params = [{transform_indices = @transform_0, window_bounds = array<i64: 8, 32>}, {transform_indices = @transform_1, window_bounds = array<i64: 32, 128>}, {pipeline_mode = #tpu.pipeline_mode<synchronous>, transform_indices = @transform_2, window_bounds = array<i64: 1, 128>}, {pipeline_mode = #tpu.pipeline_mode<synchronous>, transform_indices = @transform_3, window_bounds = array<i64: 1, 128>}, {pipeline_mode = #tpu.pipeline_mode<synchronous>, transform_indices = @transform_4, window_bounds = array<i64: 1, 128>}, {transform_indices = @transform_5, window_bounds = array<i64: 8, 128>}]} {
    %c0_i32 = arith.constant 0 : i32
    %0 = arith.cmpi eq, %arg1, %c0_i32 : i32
    %1 = arith.extui %0 : i1 to i32
    %c0_i32_0 = arith.constant 0 : i32
    %2 = arith.cmpi ne, %1, %c0_i32_0 : i32
    scf.if %2 {
      %cst_10 = arith.constant 0.000000e+00 : f32
      %12 = vector.broadcast %cst_10 : f32 to vector<8x128xf32>
      %c0_11 = arith.constant 0 : index
      %c0_12 = arith.constant 0 : index
      %13 = vector.load %arg8[%c0_11, %c0_12] : memref<8x128xf32, #tpu.memory_space<vmem>>, vector<8x128xf32>
      tpu.vector_store %arg8[%c0_11, %c0_12], %12 {strides = array<i32>} : memref<8x128xf32, #tpu.memory_space<vmem>>, vector<8x128xf32>,
    } else {
    }
    %c0 = arith.constant 0 : index
    %c0_1 = arith.constant 0 : index
    %3 = vector.load %arg8[%c0, %c0_1] : memref<8x128xf32, #tpu.memory_space<vmem>>, vector<8x128xf32>
    %c0_2 = arith.constant 0 : index
    %c0_3 = arith.constant 0 : index
    %4 = vector.load %arg2[%c0_2, %c0_3] : memref<8x32xf32, #tpu.memory_space<vmem>>, vector<8x32xf32>
    %c0_4 = arith.constant 0 : index
    %c0_5 = arith.constant 0 : index
    %5 = vector.load %arg3[%c0_4, %c0_5] : memref<32x128xf32, #tpu.memory_space<vmem>>, vector<32x128xf32>
    %cst = arith.constant dense<0.000000e+00> : vector<8x128xf32>
    %6 = tpu.matmul %4, %5, %cst {dimension_numbers = #tpu.dot_dimension_numbers<[1], [0], [0], [1], [0, 0, 1, 1], [], []>} : vector<8x32xf32>, vector<32x128xf32>, vector<8x128xf32> -> vector<8x128xf32>
    %7 = arith.addf %3, %6 : vector<8x128xf32>
    %c0_6 = arith.constant 0 : index
    %c0_7 = arith.constant 0 : index
    %8 = vector.load %arg8[%c0_6, %c0_7] : memref<8x128xf32, #tpu.memory_space<vmem>>, vector<8x128xf32>
    tpu.vector_store %arg8[%c0_6, %c0_7], %7 {strides = array<i32>} : memref<8x128xf32, #tpu.memory_space<vmem>>, vector<8x128xf32>,
    %c0_i32_8 = arith.constant 0 : i32
    %9 = arith.cmpi eq, %arg1, %c0_i32_8 : i32
    %10 = arith.extui %9 : i1 to i32
    %c0_i32_9 = arith.constant 0 : i32
    %11 = arith.cmpi ne, %10, %c0_i32_9 : i32
    scf.if %11 {
      %c0_10 = arith.constant 0 : index
      %c0_11 = arith.constant 0 : index
      %12 = vector.load %arg8[%c0_10, %c0_11] : memref<8x128xf32, #tpu.memory_space<vmem>>, vector<8x128xf32>
      %c0_12 = arith.constant 0 : index
      %c0_13 = arith.constant 0 : index
      %13 = vector.load %arg4[%c0_12, %c0_13] : memref<1x128xf32, #tpu.memory_space<vmem>>, vector<1x128xf32>
      %14 = vector.broadcast %13 : vector<1x128xf32> to vector<8x128xf32>
      %15 = arith.addf %12, %14 : vector<8x128xf32>
      %cst_14 = arith.constant dense<0.000000e+00> : vector<8xf32>
      %16 = vector.multi_reduction <add>, %15, %cst_14 [1] : vector<8x128xf32> to vector<8xf32>
      %17 = vector.shape_cast %16 : vector<8xf32> to vector<8x1xf32>
      %18 = arith.mulf %15, %15 : vector<8x128xf32>
      %cst_15 = arith.constant dense<0.000000e+00> : vector<8xf32>
      %19 = vector.multi_reduction <add>, %18, %cst_15 [1] : vector<8x128xf32> to vector<8xf32>
      %20 = vector.shape_cast %19 : vector<8xf32> to vector<8x1xf32>
      %cst_16 = arith.constant 3.125000e-02 : f32
      %21 = vector.broadcast %cst_16 : f32 to vector<8x1xf32>
      %22 = arith.mulf %17, %21 : vector<8x1xf32>
      %cst_17 = arith.constant 3.125000e-02 : f32
      %23 = vector.broadcast %cst_17 : f32 to vector<8x1xf32>
      %24 = arith.mulf %20, %23 : vector<8x1xf32>
      %25 = arith.mulf %22, %22 : vector<8x1xf32>
      %26 = arith.subf %24, %25 : vector<8x1xf32>
      %cst_18 = arith.constant 0.000000e+00 : f32
      %27 = vector.broadcast %cst_18 : f32 to vector<8x1xf32>
      %28 = arith.maximumf %26, %27 : vector<8x1xf32>
      %29 = vector.broadcast %22 : vector<8x1xf32> to vector<8x128xf32>
      %30 = arith.subf %15, %29 : vector<8x128xf32>
      %cst_19 = arith.constant 9.99999974E-6 : f32
      %31 = vector.broadcast %cst_19 : f32 to vector<8x1xf32>
      %32 = arith.addf %28, %31 : vector<8x1xf32>
      %33 = math.rsqrt %32 : vector<8x1xf32>
      %34 = vector.broadcast %33 : vector<8x1xf32> to vector<8x128xf32>
      %35 = arith.mulf %30, %34 : vector<8x128xf32>
      %c0_20 = arith.constant 0 : index
      %c0_21 = arith.constant 0 : index
      %36 = vector.load %arg5[%c0_20, %c0_21] : memref<1x128xf32, #tpu.memory_space<vmem>>, vector<1x128xf32>
      %37 = vector.broadcast %36 : vector<1x128xf32> to vector<8x128xf32>
      %38 = arith.mulf %35, %37 : vector<8x128xf32>
      %c0_22 = arith.constant 0 : index
      %c0_23 = arith.constant 0 : index
      %39 = vector.load %arg6[%c0_22, %c0_23] : memref<1x128xf32, #tpu.memory_space<vmem>>, vector<1x128xf32>
      %40 = vector.broadcast %39 : vector<1x128xf32> to vector<8x128xf32>
      %41 = arith.addf %38, %40 : vector<8x128xf32>
      %cst_24 = arith.constant 0.000000e+00 : f32
      %42 = vector.broadcast %cst_24 : f32 to vector<8x128xf32>
      %43 = arith.maximumf %41, %42 : vector<8x128xf32>
      %c0_25 = arith.constant 0 : index
      %c0_26 = arith.constant 0 : index
      %44 = vector.load %arg7[%c0_25, %c0_26] : memref<8x128xf32, #tpu.memory_space<vmem>>, vector<8x128xf32>
      tpu.vector_store %arg7[%c0_25, %c0_26], %43 {strides = array<i32>} : memref<8x128xf32, #tpu.memory_space<vmem>>, vector<8x128xf32>,
    } else {
    }
    return
  }
  func.func @transform_0(%arg0: i32, %arg1: i32) -> (i32, i32) {
    %c0_i32 = arith.constant 0 : i32
    return %arg0, %arg1 : i32, i32
  }
  func.func @transform_1(%arg0: i32, %arg1: i32) -> (i32, i32) {
    %c0_i32 = arith.constant 0 : i32
    %c0_i32_0 = arith.constant 0 : i32
    return %arg1, %c0_i32 : i32, i32
  }
  func.func @transform_2(%arg0: i32, %arg1: i32) -> (i32, i32) {
    %c0_i32 = arith.constant 0 : i32
    %c0_i32_0 = arith.constant 0 : i32
    %c0_i32_1 = arith.constant 0 : i32
    return %c0_i32, %c0_i32_0 : i32, i32
  }
  func.func @transform_3(%arg0: i32, %arg1: i32) -> (i32, i32) {
    %c0_i32 = arith.constant 0 : i32
    %c0_i32_0 = arith.constant 0 : i32
    %c0_i32_1 = arith.constant 0 : i32
    return %c0_i32, %c0_i32_0 : i32, i32
  }
  func.func @transform_4(%arg0: i32, %arg1: i32) -> (i32, i32) {
    %c0_i32 = arith.constant 0 : i32
    %c0_i32_0 = arith.constant 0 : i32
    %c0_i32_1 = arith.constant 0 : i32
    return %c0_i32, %c0_i32_0 : i32, i32
  }
  func.func @transform_5(%arg0: i32, %arg1: i32) -> (i32, i32) {
    %c0_i32 = arith.constant 0 : i32
    %c0_i32_0 = arith.constant 0 : i32
    return %arg0, %c0_i32 : i32, i32
  }
}

</mosaic_0001>

<bundles_post_ra>
// kernel: tpu_custom_call.1
= control target key start
LH: loop header
LB: loop body
LE: loop exit
PB: predicated region body
PF: predicated region fallthrough
CT: control target
= control target key end

     0   :  { %10 = vsyncpa [#allocation4], 0  ;;  %s392_s0 = inlined_call_operand.hbm [shape: f32[8,32], index: 0, kind: input, shape index: {}]   ;;  %s393_s1 = inlined_call_operand.hbm [shape: f32[32,128], index: 1, kind: input, shape index: {}]   ;;  %s394_s2 = inlined_call_operand.vmem [shape: f32[1,128], index: 2, kind: input, shape index: {}]   ;;  %s395_s3 = inlined_call_operand.vmem [shape: f32[1,128], index: 3, kind: input, shape index: {}]   ;;  %s396_s4 = inlined_call_operand.vmem [shape: f32[1,128], index: 4, kind: input, shape index: {}]   ;;  %s397_s5 = inlined_call_operand.hbm [shape: f32[8,128], index: 5, kind: output, shape index: {}]  }
   0x1   :  { %11 = vsyncpa [#allocation7], 0 }
   0x2   :  { %12 = vsyncpa [#allocation5], 0  ;;  %s302_s18 = smov [#allocation3]   ;;  %s303_s20 = smov [#allocation6]  }
   0x3   :  { %s19_s19 = sshll.u32 %s302_s18, 4  ;;  %s28_s21 = sshll.u32 %s303_s20, 4  ;;  %s20_s19 = int_to_ptr.vmem [resolvable:$true] %s19_s19  ;;  %s340_s21 = int_to_ptr.vmem [resolvable:$true] %s28_s21 }
   0x4   :  { %s230_s24 = scalar_lea.hbm %s392_s0, 128 }
   0x5   :  { %p231_p0 = scmp.ne.s32.totalorder %s392_s0, %s230_s24  ;;  %p234_p1 = scmp.lt.u32.totalorder %s230_s24, %s392_s0 }
   0x7   :  { %p236_p2 = pnand %p234_p1, %p231_p0 }
   0x9   :  { %239 = shalt.err (!%p236_p2)
}
   0xa   :  { %s240_s29 = scalar_lea.vmem %s20_s19, 128  ;;  %p245_p4 = scmp.lt.s32.totalorder %s20_s19, %s20_s19 }
   0xb   :  { %p241_p3 = scmp.ne.s32.totalorder %s20_s19, %s240_s29  ;;  %p246_p5 = scmp.lt.s32.totalorder %s240_s29, %s240_s29 }
   0xd   :  { %p247_p6 = por %p246_p5, %p245_p4 }
   0xf   :  { %p248_p7 = pnand %p247_p6, %p241_p3 }
  0x11   :  { %251 = shalt.err (!%p248_p7)
}
  0x12   :  { %22 = dma.hbm_to_vmem [thread:$0]  %s392_s0, 128, %s20_s19, [#allocation4]  }
  0x13   :  { %s252_s9 = scalar_lea.hbm %s393_s1, 512 }
  0x14   :  { %p253_p8 = scmp.ne.s32.totalorder %s393_s1, %s252_s9  ;;  %p256_p9 = scmp.lt.u32.totalorder %s252_s9, %s393_s1 }
  0x16   :  { %p258_p10 = pnand %p256_p9, %p253_p8 }
  0x18   :  { %261 = shalt.err (!%p258_p10)
}
  0x19   :  { %s262_s14 = scalar_lea.vmem %s340_s21, 512  ;;  %p267_p12 = scmp.lt.s32.totalorder %s340_s21, %s340_s21 }
  0x1a   :  { %p263_p11 = scmp.ne.s32.totalorder %s340_s21, %s262_s14  ;;  %p268_p13 = scmp.lt.s32.totalorder %s262_s14, %s262_s14 }
  0x1c   :  { %p269_p0 = por %p268_p13, %p267_p12 }
  0x1e   :  { %p270_p1 = pnand %p269_p0, %p263_p11 }
  0x20   :  { %273 = shalt.err (!%p270_p1)
}
  0x21   :  { %s304_s0 = smov 128   ;;  %s305_s15 = smov 8  }
  0x22   :  { %34 = dma.hbm_to_vmem [thread:$0]  %s393_s1, 512, %s340_s21, [#allocation7], %s304_s0, %s304_s0, %s305_s15  }
  0x23   :  { %296 = dma.done.wait [#allocation4], 128  }
  0x24   :  { %297 = vsyncadd [#allocation4], 4294967168 }
  0x25   :  { %298 = dma.done.wait [#allocation7], 512  }
  0x26   :  { %299 = vsyncadd [#allocation7], 4294966784  ;;  %v306_v0 = vmov 0.0|0.0   ;;  %vm307_vm0 = vmmov 0   ;;  %v308_v1 = vmov 0.0   ;;  %v54_v2 = vld [vmem:[#allocation6] sm:$0xff] }
  0x27   :  { %214 = vmatprep.subr.bf16.mxu0 %v306_v0  ;;  %211 = vmatprep.mubr.msk.f32.mxu0 %vm307_vm0, %v308_v1  ;;  %v55_v3 = vld [vmem:[#allocation6 + $0x8] sm:$0xff]  ;;  %v56_v4 = vld [vmem:[#allocation6 + $0x10] sm:$0xff]  ;;  %v57_v6 = vld [vmem:[#allocation6 + $0x18] sm:$0xff]  ;;  %vm58_vm1 = vcmask 261120   ;;  %s309_s22 = smov [#allocation8]  }
  0x28   :  { %v215_v5 = vpack.c.bf16 %v55_v3, %v54_v2  ;;  %v218_v7 = vpack.c.bf16 %v57_v6, %v56_v4  ;;  %v53_v8 = vld [vmem:[#allocation3] sm:$0xff]  ;;  %s184_s23 = sshll.u32 %s309_s22, 4  ;;  %s185_s23 = int_to_ptr.vmem [resolvable:$true] %s184_s23 }
  0x29   :  { %v195_v9 = vld [vmem:[%s394_s2] ss:$0 sm:$0xff]  ;;  %s274_s24 = scalar_lea.vmem %s185_s23, 128  ;;  %p279_p3 = scmp.lt.s32.totalorder %s185_s23, %s185_s23 }
  0x2a   :  { %216 = vmatpush3.bf16.msra.mxu0 %v215_v5  ;;  %v196_v24 = vld [vmem:[%s395_s3] ss:$0 sm:$0xff]  ;;  %p275_p2 = scmp.ne.s32.totalorder %s185_s23, %s274_s24  ;;  %p280_p4 = scmp.lt.s32.totalorder %s274_s24, %s274_s24 }
  0x2b   :  { %217 = vmatprep.subr.bf16.mxu0 %v306_v0  ;;  %v197_v26 = vld [vmem:[%s396_s4] ss:$0 sm:$0xff] }
  0x2c   :  { %p281_p5 = por %p280_p4, %p279_p3 }
  0x2e   :  { %219 = vmatpush3.bf16.msra.mxu0 %v218_v7  ;;  %p282_p6 = pnand %p281_p5, %p275_p2 }
  0x31   :  { %212 = vmatmul.mubr.msk.f32.vlgmr.msra.gmra.mrb[0].mxu0 %vm58_vm1, %v53_v8 }
 0x104   :  { %v128_v10 = vpop.f32.mrb[0].mxu0 }
 0x105   :  { %v145_v11 = vadd.f32 %v195_v9, %v128_v10  ;;  %v213_v12 = vpop.f32.mrb[1].mxu0 }
 0x107   :  { %146 = vadd.xlane.f32.xlu0 %v145_v11  ;;  %v148_v13 = vmul.f32 %v145_v11, %v145_v11 }
 0x10b   :  { %149 = vadd.xlane.f32.xlu0 %v148_v13 }
 0x194   :  { %v147_v14 = vpop.xlane.xlu0 %146 }
 0x195   :  { %v151_v15 = vmul.f32 0.03125, %v147_v14 }
 0x197   :  { %v153_v17 = vmul.f32 %v151_v15, %v151_v15  ;;  %v156_v22 = vsub.f32 %v145_v11, %v151_v15 }
 0x198   :  { %v150_v16 = vpop.xlane.xlu0 %149 }
 0x199   :  { %v152_v18 = vmul.f32 0.03125, %v150_v16 }
 0x19b   :  { %v154_v19 = vsub.f32 %v152_v18, %v153_v17 }
 0x19d   :  { %v155_v20 = vmax.f32 %v154_v19, 0.0 }
 0x19f   :  { %v157_v21 = vadd.f32 1e-05, %v155_v20 }
 0x1a1   :  { %228 = vrsqrt.f32 %v157_v21 }
 0x1ab   :  { %v229_v23 = vpop.eup %228 }
 0x1ac   :  { %v159_v25 = vmul.f32 %v229_v23, %v156_v22 }
 0x1ae   :  { %v167_v27 = vmul.f32 %v196_v24, %v159_v25 }
 0x1b0   :  { %v175_v28 = vadd.f32 %v197_v26, %v167_v27 }
 0x1b2   :  { %v176_v29 = vmax.f32 %v175_v28, 0.0 }
 0x1b4   :  { %177 = vst [vmem:[#allocation8] sm:$0xff] %v176_v29 }
 0x1b5   :  { %285 = shalt.err (!%p282_p6)
}
 0x1b6   :  { %s286_s26 = scalar_lea.hbm %s397_s5, 128 }
 0x1b7   :  { %p287_p7 = scmp.ne.s32.totalorder %s397_s5, %s286_s26  ;;  %p290_p8 = scmp.lt.u32.totalorder %s286_s26, %s397_s5 }
 0x1b9   :  { %p292_p9 = pnand %p290_p8, %p287_p7 }
 0x1bb   :  { %295 = shalt.err (!%p292_p9)
}
 0x1bc   :  { %187 = dma.vmem_to_hbm [thread:$0]  %s185_s23, 128, %s397_s5, [#allocation5]  }
 0x1bd   :  { %300 = dma.done.wait [#allocation5], 128  }
 0x1be   :  { %301 = vsyncadd [#allocation5], 4294967168 }
 0x1bf   :  { %191 = vsyncpa [#allocation4], 1 }
 0x1c0   :  { %192 = vsyncpa [#allocation7], 1 }
 0x1c1   :  { %193 = vsyncpa [#allocation5], 1 }

</bundles_post_ra>
